<compile_context>
chip_gen: v5e
topology: v5e:2x2
jax: 0.10.0
libtpu: 0.0.40
codegen_flags: <defaults>
</compile_context>

<pallas_src>
import jax
import jax.numpy as jnp
from jax import lax
from jax.experimental import pallas as pl
from jax.experimental.pallas import tpu as pltpu

LANE = 128
ROW_TILE = 4096          # 4096 x 128 f32 = 2 MiB per block (double-buffers fit everywhere)
FUSED_MAX_ROWS = 4096    # <= 2 MiB f32 slab -> single fused VMEM-resident kernel
NUM_SHARDS_MAX = 2       # split pass-1 reduction across TCs (helps v7x; harmless on 1-TC chips)


# ----------------------------------------------------------------------------
# Fused small-input path: whole tensor resident in VMEM, single kernel.
# ----------------------------------------------------------------------------
def _frnorm_fused_kernel(params_ref, x_ref, o_ref):
    alpha = params_ref[0]
    beta = params_ref[1]
    tau = params_ref[2]
    inv_b = params_ref[3]

    xf = x_ref[...].astype(jnp.float32)
    msn = jnp.sum(xf * xf) * inv_b
    scale = alpha * lax.rsqrt(msn + jnp.float32(1e-16))   # fold alpha into the scale
    o_ref[...] = jnp.maximum(xf * scale + beta, tau).astype(o_ref.dtype)


# ----------------------------------------------------------------------------
# Pass 1 (large path): sum of squares -> per-shard (1, LANE) partial sums.
# ----------------------------------------------------------------------------
def _make_sumsq_kernel(rows, row_tile, blocks_per_shard, needs_mask):
    def kernel(x_ref, part_ref):
        j = pl.program_id(1)

        @pl.when(j == 0)
        def _():
            part_ref[...] = jnp.zeros_like(part_ref)

        xf = x_ref[...].astype(jnp.float32)
        xsq = xf * xf

        if needs_mask:
            # Ragged last tile / duplicated out-of-range tiles: zero their rows.
            blk = pl.program_id(0) * blocks_per_shard + j
            valid = rows - blk * row_tile          # may be <= 0 for clamped blocks
            row_ids = lax.broadcasted_iota(jnp.int32, xsq.shape, 0)
            xsq = jnp.where(row_ids < valid, xsq, 0.0)

        # Lane-wise partial sums only (VPU adds); the scalar reduction happens once
        # in the wrapper, not per grid step.
        part_ref[...] += jnp.sum(xsq, axis=0, keepdims=True)[None]

    return kernel


# ----------------------------------------------------------------------------
# Pass 2 (large path): elementwise normalize + affine + thresholded linear unit.
# ----------------------------------------------------------------------------
def _frnorm_ew_kernel(sumsq_ref, params_ref, x_ref, o_ref):
    alpha = params_ref[0]
    beta = params_ref[1]
    tau = params_ref[2]
    inv_b = params_ref[3]

    msn = sumsq_ref[0] * inv_b
    scale = alpha * lax.rsqrt(msn + jnp.float32(1e-16))   # alpha folded in

    xf = x_ref[...].astype(jnp.float32)
    o_ref[...] = jnp.maximum(xf * scale + beta, tau).astype(o_ref.dtype)


def frnorm(x, alpha, beta, tau):
    orig_shape = x.shape
    orig_dtype = x.dtype
    b = x.shape[0]
    n = x.size

    rem = n % LANE
    if rem == 0:
        rows = n // LANE
        x2d = x.reshape(rows, LANE)          # row-major view, no extra HBM copy of note
        ragged_lane = False
    else:
        # Rare ragged case: pad to the next lane multiple (< 128 extra elements).
        # TODO(synk): avoid this full-array pad copy by lane-masking inside the kernels.
        pad = LANE - rem
        flat = jnp.pad(x.reshape(-1), (0, pad))
        rows = (n + pad) // LANE
        x2d = flat.reshape(rows, LANE)
        ragged_lane = True

    params = jnp.array([alpha, beta, tau, 1.0 / b], dtype=jnp.float32)

    if rows <= FUSED_MAX_ROWS:
        # Small/medium input: single fused kernel, whole slab resident in VMEM.
        out2d = pl.pallas_call(
            _frnorm_fused_kernel,
            out_shape=jax.ShapeDtypeStruct((rows, LANE), orig_dtype),
            in_specs=[
                pl.BlockSpec(memory_space=pltpu.SMEM),   # [alpha, beta, tau, 1/B]
                pl.BlockSpec(memory_space=pltpu.VMEM),   # whole x slab
            ],
            out_specs=pl.BlockSpec(memory_space=pltpu.VMEM),
        )(params, x2d)
    else:
        row_tile = ROW_TILE
        num_blocks = pl.cdiv(rows, row_tile)
        num_shards = NUM_SHARDS_MAX if num_blocks >= 2 * NUM_SHARDS_MAX else 1
        bps = pl.cdiv(num_blocks, num_shards)
        needs_mask = (num_shards * bps * row_tile) != rows

        def x_map(s, j):
            blk = s * bps + j
            if needs_mask:
                blk = jnp.minimum(blk, num_blocks - 1)   # keep HBM reads in bounds
            return (blk, 0)

        # Pass 1: per-shard lane-wise partial sums of squares.
        partials = pl.pallas_call(
            _make_sumsq_kernel(rows, row_tile, bps, needs_mask),
            out_shape=jax.ShapeDtypeStruct((num_shards, 1, LANE), jnp.float32),
            grid_spec=pltpu.PrefetchScalarGridSpec(
                num_scalar_prefetch=0,
                grid=(num_shards, bps),
                in_specs=[pl.BlockSpec((row_tile, LANE), x_map)],
                out_specs=pl.BlockSpec((1, 1, LANE), lambda s, j: (s, 0, 0)),
            ),
            compiler_params=pltpu.CompilerParams(
                dimension_semantics=("parallel", "arbitrary")),
        )(x2d)

        # Tiny reduction (num_shards * 128 elems) to the global scalar.
        sumsq = jnp.sum(partials).reshape(1)

        # Pass 2: elementwise FRN + TLU over big lane-dense tiles.
        out2d = pl.pallas_call(
            _frnorm_ew_kernel,
            out_shape=jax.ShapeDtypeStruct((rows, LANE), orig_dtype),
            grid_spec=pltpu.PrefetchScalarGridSpec(
                num_scalar_prefetch=0,
                grid=(num_blocks,),
                in_specs=[
                    pl.BlockSpec(memory_space=pltpu.SMEM),            # sumsq scalar
                    pl.BlockSpec(memory_space=pltpu.SMEM),            # params
                    pl.BlockSpec((row_tile, LANE), lambda i: (i, 0)),
                ],
                out_specs=pl.BlockSpec((row_tile, LANE), lambda i: (i, 0)),
            ),
            compiler_params=pltpu.CompilerParams(
                dimension_semantics=("parallel",)),
        )(sumsq, params, x2d)

    if ragged_lane:
        out = out2d.reshape(-1)[:n].reshape(orig_shape)
    else:
        out = out2d.reshape(orig_shape)
    return out


def frnorm_ref(x, alpha, beta, tau):
    """Pure-JAX reference matching the PyTorch module exactly."""
    xf = x.astype(jnp.float32)
    msn = jnp.sum(xf ** 2) / x.shape[0]
    norm = xf * lax.rsqrt(msn + 1e-16)
    norm = alpha * norm + beta
    return jnp.maximum(norm, tau).astype(x.dtype)


if __name__ == "__main__":
    key = jax.random.PRNGKey(0)

    # Deterministic parameter init per FRNorm.__init__
    alpha = 1.0
    beta = 0.0
    tau = 0.0

    # Small NCHW input (B=2, C=4, H=W=16) -> fused single-kernel path.
    x = jax.random.normal(key, (2, 4, 16, 16), dtype=jnp.float32)
    out = jax.block_until_ready(frnorm(x, alpha, beta, tau))
    ref = frnorm_ref(x, alpha, beta, tau)
    assert out.shape == x.shape and out.dtype == x.dtype
    assert jnp.allclose(out, ref, atol=1e-5, rtol=1e-5), "small-path mismatch vs reference"

    # Larger input -> two-pass path (sharded pass-1 reduction + ragged-tile masking).
    x_big = jax.random.normal(jax.random.PRNGKey(1), (2, 8242, 128), dtype=jnp.float32)
    out_b = jax.block_until_ready(frnorm(x_big, alpha, beta, tau))
    ref_b = frnorm_ref(x_big, alpha, beta, tau)
    assert out_b.shape == x_big.shape and out_b.dtype == x_big.dtype
    assert jnp.allclose(out_b, ref_b, atol=1e-5, rtol=1e-4), "two-pass mismatch vs reference"

    print("KERNEL_OK")
</pallas_src>

<mosaic_0001>
module attributes {stable_mosaic.version = 11 : i64} {
  func.func @_frnorm_fused_kernel(%arg0: memref<4xf32, #tpu.memory_space<smem>>, %arg1: memref<16x128xf32, #tpu.memory_space<vmem>>, %arg2: memref<16x128xf32, #tpu.memory_space<vmem>>) attributes {dimension_semantics = [], scalar_prefetch = 0 : i64, scratch_operands = 0 : i64, tpu.core_type = #tpu.core_type<tc>} {
    %c0 = arith.constant 0 : index
    %0 = memref.load %arg0[%c0] : memref<4xf32, #tpu.memory_space<smem>>
    %c1 = arith.constant 1 : index
    %1 = memref.load %arg0[%c1] : memref<4xf32, #tpu.memory_space<smem>>
    %c2 = arith.constant 2 : index
    %2 = memref.load %arg0[%c2] : memref<4xf32, #tpu.memory_space<smem>>
    %c3 = arith.constant 3 : index
    %3 = memref.load %arg0[%c3] : memref<4xf32, #tpu.memory_space<smem>>
    %c0_0 = arith.constant 0 : index
    %c0_1 = arith.constant 0 : index
    %4 = vector.load %arg1[%c0_0, %c0_1] : memref<16x128xf32, #tpu.memory_space<vmem>>, vector<16x128xf32>
    %5 = arith.mulf %4, %4 : vector<16x128xf32>
    %6 = vector.shape_cast %5 : vector<16x128xf32> to vector<1x16x128xf32>
    %cst = arith.constant dense<0.000000e+00> : vector<1xf32>
    %7 = vector.multi_reduction <add>, %6, %cst [1, 2] : vector<1x16x128xf32> to vector<1xf32>
    %8 = vector.shape_cast %7 : vector<1xf32> to vector<1x1x1xf32>
    %9 = vector.extract %8[0, 0, 0] : f32 from vector<1x1x1xf32>
    %10 = arith.mulf %9, %3 : f32
    %cst_2 = arith.constant 1.000000e-16 : f32
    %11 = arith.addf %10, %cst_2 : f32
    %12 = math.rsqrt %11 : f32
    %13 = arith.mulf %0, %12 : f32
    %14 = vector.broadcast %13 : f32 to vector<16x128xf32>
    %15 = arith.mulf %4, %14 : vector<16x128xf32>
    %16 = vector.broadcast %1 : f32 to vector<16x128xf32>
    %17 = arith.addf %15, %16 : vector<16x128xf32>
    %18 = vector.broadcast %2 : f32 to vector<16x128xf32>
    %19 = arith.maximumf %17, %18 : vector<16x128xf32>
    %c0_3 = arith.constant 0 : index
    %c0_4 = arith.constant 0 : index
    %20 = vector.load %arg2[%c0_3, %c0_4] : memref<16x128xf32, #tpu.memory_space<vmem>>, vector<16x128xf32>
    tpu.vector_store %arg2[%c0_3, %c0_4], %19 {strides = array<i32>} : memref<16x128xf32, #tpu.memory_space<vmem>>, vector<16x128xf32>,
    return
  }
}

</mosaic_0001>

<bundles_post_ra>
// kernel: tpu_custom_call.1
= control target key start
LH: loop header
LB: loop body
LE: loop exit
PB: predicated region body
PF: predicated region fallthrough
CT: control target
= control target key end

     0   :  { %7 = vsyncpa [#allocation5], 0  ;;  %s220_s0 = inlined_call_operand.hbm [shape: f32[4], index: 0, kind: input, shape index: {}]   ;;  %s221_s1 = inlined_call_operand.hbm [shape: f32[16,128], index: 1, kind: input, shape index: {}]   ;;  %s222_s2 = inlined_call_operand.hbm [shape: f32[16,128], index: 2, kind: output, shape index: {}]  }
   0x1   :  { %8 = vsyncpa [#allocation3], 0 }
   0x2   :  { %9 = vsyncpa [#allocation4], 0  ;;  %s15_s11 = sshll.u32 %s220_s0, 4  ;;  %s23_s14 = sshll.u32 %s221_s1, 4  ;;  %s16_s11 = int_to_ptr.hbm [resolvable:$true] %s15_s11  ;;  %s24_s14 = int_to_ptr.hbm [resolvable:$true] %s23_s14 }
   0x3   :  { %s185_s15 = smov [#allocation2]   ;;  %s186_s16 = smov [#allocation6]  }
   0x4   :  { %18 = dma.hbm_to_smem %s16_s11, 16, %s185_s15, [#allocation5]  }
   0x5   :  { %s25_s17 = sshll.u32 %s186_s16, 4  ;;  %s187_s18 = smov 128   ;;  %s26_s17 = int_to_ptr.vmem [resolvable:$true] %s25_s17 }
   0x6   :  { %s188_s19 = smov 8  }
   0x7   :  { %31 = dma.hbm_to_vmem [thread:$0]  %s24_s14, 256, %s26_s17, [#allocation3], %s187_s18, %s187_s18, %s188_s19  }
   0x8   :  { %179 = dma.done.wait [#allocation5], 16  }
   0x9   :  { %180 = vsyncadd [#allocation5], 4294967280 }
   0xa   :  { %181 = dma.done.wait [#allocation3], 256  }
   0xb   :  { %182 = vsyncadd [#allocation3], 4294967040 }
   0xc   :  { %40 = sfence }
   0xd   :  { %v45_v0 = vld [vmem:[#allocation6] sm:$0xff]  ;;  %v46_v1 = vld [vmem:[#allocation6 + $0x8] sm:$0xff]  ;;  %s107_s0 = sld [smem:[#allocation2 + $0x3]]  ;;  %s189_s27 = smov [#allocation7]  }
   0xe   :  { %v47_v2 = vmul.f32 %v45_v0, %v45_v0  ;;  %v48_v3 = vmul.f32 %v46_v1, %v46_v1  ;;  %s41_s22 = sld [smem:[#allocation2]]  ;;  %s89_s28 = sshll.u32 %s189_s27, 4  ;;  %s90_s28 = int_to_ptr.vmem [resolvable:$true] %s89_s28 }
   0xf   :  { %s105_s23 = sld [smem:[#allocation2 + $0x1]]  ;;  %s91_s3 = sshll.u32 %s222_s2, 4  ;;  %s92_s3 = int_to_ptr.hbm [resolvable:$true] %s91_s3 }
  0x10   :  { %v49_v4 = vadd.f32 %v48_v3, %v47_v2  ;;  %s106_s24 = sld [smem:[#allocation2 + $0x2]] }
  0x12   :  { %50 = vadd.xlane.f32.xlu0 %v49_v4 }
  0x15   :  { %v77_v21 = vstv %s105_s23 }
  0x16   :  { %v80_v24 = vstv %s106_s24 }
  0x85   :  { %v51_v5 = vpop.xlane.xlu0 %50 }
  0x86   :  { %v52_v6 = vrot.slane %v51_v5, 4 }
  0x88   :  { %v53_v7 = vadd.f32 %v52_v6, %v51_v5 }
  0x8a   :  { %v54_v8 = vrot.slane %v53_v7, 2 }
  0x8c   :  { %v55_v9 = vadd.f32 %v54_v8, %v53_v7 }
  0x8e   :  { %v56_v10 = vrot.slane %v55_v9, 1 }
  0x90   :  { %v57_v11 = vadd.f32 %v56_v10, %v55_v9 }
  0x92   :  { %108 = vpush %v57_v11 }
  0xc3   :  { %s109_s1 = spop %108 }
  0xc4   :  { %s59_s20 = smul.f32 %s109_s1, %s107_s0 }
  0xc6   :  { %s60_s21 = sadd.f32 1e-16, %s59_s20 }
  0xc8   :  { %v61_v12 = vstv %s60_s21 }
  0xc9   :  { %117 = vrsqrt.f32 %v61_v12  ;;  %vm68_vm1 = vweird.f32 %v61_v12 }
  0xcf   :  { %v118_v13 = vpop.eup %117 }
  0xd0   :  { %v63_v14 = vmul.f32 %v118_v13, %v61_v12  ;;  %vm69_vm0 = vweird.f32 %v118_v13 }
  0xd1   :  { %vm70_vm2 = vmor %vm68_vm1, %vm69_vm0 }
  0xd2   :  { %v64_v15 = vmul.f32 %v118_v13, %v63_v14 }
  0xd4   :  { %v65_v16 = vmul.f32 0.5, %v64_v15 }
  0xd6   :  { %v66_v17 = vsub.f32 1.5, %v65_v16 }
  0xd8   :  { %v67_v18 = vmul.f32 %v118_v13, %v66_v17 }
  0xda   :  { %v71_v19 = vsel %vm70_vm2, %v118_v13, %v67_v18 }
  0xdb   :  { %110 = vpush %v71_v19 }
 0x10c   :  { %s111_s25 = spop %110 }
 0x10d   :  { %s73_s26 = smul.f32 %s111_s25, %s41_s22 }
 0x10f   :  { %v74_v20 = vstv %s73_s26 }
 0x110   :  { %v75_v22 = vmul.f32 %v74_v20, %v45_v0  ;;  %v76_v23 = vmul.f32 %v74_v20, %v46_v1 }
 0x112   :  { %v78_v25 = vadd.f32 %v77_v21, %v75_v22  ;;  %v79_v26 = vadd.f32 %v77_v21, %v76_v23 }
 0x114   :  { %v81_v27 = vmax.f32 %v78_v25, %v80_v24  ;;  %v82_v28 = vmax.f32 %v79_v26, %v80_v24 }
 0x116   :  { %83 = vst [vmem:[#allocation7] sm:$0xff] %v81_v27 }
 0x117   :  { %84 = vst [vmem:[#allocation7 + $0x8] sm:$0xff] %v82_v28 }
 0x118   :  { %97 = dma.vmem_to_hbm [thread:$0]  %s90_s28, 256, %s92_s3, [#allocation4], %s187_s18, %s187_s18, %s188_s19  }
 0x119   :  { %183 = dma.done.wait [#allocation4], 256  }
 0x11a   :  { %184 = vsyncadd [#allocation4], 4294967040 }
 0x11b   :  { %102 = vsyncpa [#allocation3], 1 }
 0x11c   :  { %103 = vsyncpa [#allocation4], 1 }
 0x11d   :  { %104 = vsyncpa [#allocation5], 1 }

</bundles_post_ra>
